<compile_context>
chip_gen: v5e
topology: v5e:2x2
jax: 0.10.0
libtpu: 0.0.40
codegen_flags: <defaults>
</compile_context>

<pallas_src>
import functools
import math

import jax
import jax.numpy as jnp
from jax.experimental import pallas as pl
from jax.experimental.pallas import tpu as pltpu


# ----------------------------------------------------------------------------
# Plain-JAX glue (data-dependent sampling / grouping)
# ----------------------------------------------------------------------------
def farthest_point_sample(xyz, npoint):
    """xyz: [B, N, 3] -> centroid indices [B, npoint] (int32)."""
    B, N, _ = xyz.shape

    def body(i, state):
        centroids, distance, farthest = state
        centroids = centroids.at[:, i].set(farthest)
        centroid = jnp.take_along_axis(xyz, farthest[:, None, None], axis=1)  # [B,1,3]
        dist = jnp.sum((xyz - centroid) ** 2, axis=-1)                        # [B,N]
        distance = jnp.minimum(distance, dist)
        farthest = jnp.argmax(distance, axis=-1).astype(jnp.int32)
        return centroids, distance, farthest

    init = (
        jnp.zeros((B, npoint), jnp.int32),
        jnp.full((B, N), 1e10, jnp.float32),
        # TODO(synk): torch uses randint(0, N, (B,)) for the first centroid;
        # fixed to index 0 here for determinism.
        jnp.zeros((B,), jnp.int32),
    )
    centroids, _, _ = jax.lax.fori_loop(0, npoint, body, init)
    return centroids


def index_points(points, idx):
    """points: [B, N, C], idx: [B, ...] -> [B, ..., C]."""
    return jax.vmap(lambda p, i: p[i])(points, idx)


def square_distance(src, dst):
    """src: [B, N, C], dst: [B, M, C] -> [B, N, M]."""
    dist = -2.0 * jnp.matmul(src, jnp.swapaxes(dst, 1, 2))
    dist = dist + jnp.sum(src ** 2, axis=-1)[:, :, None]
    dist = dist + jnp.sum(dst ** 2, axis=-1)[:, None, :]
    return dist


def query_ball_point(radius, nsample, xyz, new_xyz):
    """xyz: [B, N, 3], new_xyz: [B, S, 3] -> group_idx [B, S, nsample] int32."""
    B, N, _ = xyz.shape
    S = new_xyz.shape[1]
    sqrdists = square_distance(new_xyz, xyz)                       # [B,S,N]
    group_idx = jnp.broadcast_to(jnp.arange(N, dtype=jnp.int32), (B, S, N))
    group_idx = jnp.where(sqrdists > radius ** 2, N, group_idx)
    group_idx = jnp.sort(group_idx, axis=-1)[:, :, :nsample]
    group_first = jnp.broadcast_to(group_idx[:, :, :1], group_idx.shape)
    group_idx = jnp.where(group_idx == N, group_first, group_idx)
    return group_idx


# ----------------------------------------------------------------------------
# Tiling plan (static, shape-only)
# ----------------------------------------------------------------------------
def _vmem_capacity_bytes():
    try:
        info = pltpu.get_tpu_info()
        cap = getattr(info, "vmem_capacity_bytes", None)
        if cap:
            return int(cap)
    except Exception:
        pass
    return 64 * 2 ** 20        # conservative (v7x per-TC physical VMEM)


def plan_msg_tiling(B, S, Ks, cins, max_couts, c_total, kc_max=8):
    """Choose (S_pad, s_tile, n_st, n_kc, per-scale Kc, vmem_limit)."""
    cap = _vmem_capacity_bytes()
    budget = int(0.30 * cap)                     # working-set budget per step
    S_pad = max(128, -(-S // 128) * 128)         # dense lane stores (pad S up)

    # K-chunking: smallest common divisor n_kc of all K_i such that the
    # largest chunk max(K)/n_kc <= kc_max (4-8 neighbours folded onto lanes).
    g = Ks[0]
    for k in Ks[1:]:
        g = math.gcd(g, k)
    divisors = [d for d in range(1, g + 1) if g % d == 0]
    n_kc = next((d for d in divisors if max(Ks) // d <= kc_max), g)

    def est(t, n):
        kcs = [k // n for k in Ks]
        inp = 2 * sum(ci * kc * t * 2 for ci, kc in zip(cins, kcs))   # bf16, 2x buf
        act = 3 * max(cm * kc for cm, kc in zip(max_couts, kcs)) * t * 4
        out = 2 * c_total * t * 4
        return inp + act + out

    cands = sorted({t for t in (S_pad, 2048, 1024, 512, 256, 128)
                    if t <= S_pad and S_pad % t == 0 and t % 128 == 0},
                   reverse=True)
    s_tile = cands[-1]
    for t in cands:
        if est(t, n_kc) <= budget:
            s_tile = t
            break
    # If even the smallest tile overflows the budget, deepen the K chunking.
    while est(s_tile, n_kc) > budget:
        bigger = [d for d in divisors if d > n_kc]
        if not bigger:
            break
        n_kc = bigger[0]

    n_st = S_pad // s_tile
    # v7x: keep both TensorCores busy — guarantee >= 2 parallel grid steps.
    if B * n_st < 2 and s_tile % 256 == 0:
        s_tile //= 2
        n_st *= 2

    Kcs = [k // n_kc for k in Ks]
    vmem_limit = int(min(0.75 * cap, max(32 * 2 ** 20, 2 * est(s_tile, n_kc))))
    return dict(S_pad=S_pad, s_tile=s_tile, n_st=n_st, n_kc=n_kc, Kcs=Kcs,
                vmem_limit=vmem_limit)


# ----------------------------------------------------------------------------
# Grouping in the kernel-native layout: [B, n_st, n_kc, Cin, Kc, s_tile]
# ----------------------------------------------------------------------------
def prepare_groups(xyz, points, npoint, radius_list, nsample_list, plan):
    """xyz: [B, 3, N], points: [B, D, N] or None.
    Returns (new_xyz_cf [B,3,S], list of grouped bf16 tensors of shape
    [B, n_st, n_kc, Cin, Kc, s_tile])."""
    B = xyz.shape[0]
    S = npoint
    S_pad, s_tile = plan["S_pad"], plan["s_tile"]
    n_st, n_kc = plan["n_st"], plan["n_kc"]
    Kcs = plan["Kcs"]

    xyz_t = jnp.transpose(xyz, (0, 2, 1))                 # [B, N, 3]
    fps_idx = farthest_point_sample(xyz_t, S)             # [B, S]
    new_xyz_t = index_points(xyz_t, fps_idx)              # [B, S, 3]
    new_xyz_cf = jnp.transpose(new_xyz_t, (0, 2, 1))      # [B, 3, S]

    # Centroids arranged for the kernel layout: [B, n_st, 1, 3, 1, s_tile]
    nx_pad = jnp.pad(new_xyz_cf, ((0, 0), (0, 0), (0, S_pad - S)))
    nx = nx_pad.reshape(B, 3, n_st, s_tile).transpose(0, 2, 1, 3)
    nx = nx[:, :, None, :, None, :]

    def gather_one(src_cf, idx):          # src_cf [C, N], idx [n_st,n_kc,Kc,s_tile]
        g = src_cf[:, idx]                # [C, n_st, n_kc, Kc, s_tile]
        return jnp.moveaxis(g, 0, 2)      # [n_st, n_kc, C, Kc, s_tile]

    grouped_list = []
    for radius, K, Kc in zip(radius_list, nsample_list, Kcs):
        group_idx = query_ball_point(radius, K, xyz_t, new_xyz_t)      # [B, S, K]
        group_idx = jnp.pad(group_idx, ((0, 0), (0, S_pad - S), (0, 0)))
        idx5 = (jnp.transpose(group_idx, (0, 2, 1))                    # [B, K, S_pad]
                .reshape(B, n_kc, Kc, n_st, s_tile)
                .transpose(0, 3, 1, 2, 4))                             # [B,n_st,n_kc,Kc,s_tile]
        gxyz = jax.vmap(gather_one)(xyz, idx5)          # [B, n_st, n_kc, 3, Kc, s_tile]
        gxyz = gxyz - nx                                 # centroid-relative coords (f32)
        if points is not None:
            gpts = jax.vmap(gather_one)(points, idx5)    # [B, n_st, n_kc, D, Kc, s_tile]
            grouped = jnp.concatenate([gpts, gxyz], axis=3)
        else:
            grouped = gxyz
        # Only bf16 hits HBM for the K-expanded tensor (halves that traffic).
        grouped_list.append(grouped.astype(jnp.bfloat16))
    return new_xyz_cf, grouped_list


# ----------------------------------------------------------------------------
# Pallas kernel: fused multi-scale MLP stack + max over K (K folded on lanes)
# ----------------------------------------------------------------------------
def _build_msg_kernel(n_scales, Kcs, n_layers, offs, couts, s_tile):
    def kernel(*refs):
        out_ref = refs[-1]                       # [c_total, s_tile] f32, resident over kc
        x_refs = refs[:n_scales]                 # each [Cin_i, Kc_i * s_tile] bf16
        p_refs = refs[n_scales:-1]               # flattened (W bf16, bias f32) per layer
        kc = pl.program_id(2)

        @pl.when(kc == 0)
        def _():
            # ReLU output is >= 0, so a zero init is an exact max identity.
            out_ref[...] = jnp.zeros_like(out_ref)

        p = 0
        for i in range(n_scales):
            layer_refs = [(p_refs[p + 2 * l], p_refs[p + 2 * l + 1])
                          for l in range(n_layers[i])]
            p += 2 * n_layers[i]
            Kc, c_last, off = Kcs[i], couts[i], offs[i]

            # One matmul per layer over the full Kc*s_tile lane block
            # (BN scale is folded into W; only bias-add + ReLU on the VPU).
            h = x_refs[i][...]                                   # bf16 [Cin, Kc*s_tile]
            z = None
            for li, (w_r, b_r) in enumerate(layer_refs):
                z = jnp.dot(w_r[...], h, preferred_element_type=jnp.float32)
                z = jnp.maximum(z + b_r[...], 0.0)               # f32 [Cout, Kc*s_tile]
                if li + 1 < len(layer_refs):
                    h = z.astype(jnp.bfloat16)

            # Max over the Kc neighbour segments: static 128-aligned lane
            # slices (free vreg selection, no reshape / relayout).
            m = z[:, :s_tile]
            for k in range(1, Kc):
                m = jnp.maximum(m, z[:, k * s_tile:(k + 1) * s_tile])

            # Running max across K-chunk grid steps (output block resident).
            out_ref[off:off + c_last, :] = jnp.maximum(
                out_ref[off:off + c_last, :], m)
    return kernel


def run_msg_mlp_fused(grouped5_list, params_list, plan, c_total):
    """grouped5_list[i]: [B, n_st, n_kc, Cin_i, Kc_i*s_tile] (bf16);
    params_list[i]: list of (W[Cout,Cin] bf16, bias[Cout,1] f32) with BN folded.
    Returns [B, c_total, S_pad] float32."""
    n_scales = len(grouped5_list)
    B = grouped5_list[0].shape[0]
    s_tile, n_st, n_kc = plan["s_tile"], plan["n_st"], plan["n_kc"]
    Kcs = plan["Kcs"]
    cins = [g.shape[3] for g in grouped5_list]
    n_layers = [len(layers) for layers in params_list]
    couts = [layers[-1][0].shape[0] for layers in params_list]

    offs, off = [], 0
    for c in couts:
        offs.append(off)
        off += c

    grid = (B, n_st, n_kc)

    in_specs, args = [], []
    for g, ci, kc_i in zip(grouped5_list, cins, Kcs):
        in_specs.append(pl.BlockSpec((None, None, None, ci, kc_i * s_tile),
                                     lambda b, st, k: (b, st, k, 0, 0)))
        args.append(g)
    for layers in params_list:
        for (w, bias) in layers:
            co, ci = w.shape
            in_specs.append(pl.BlockSpec((co, ci), lambda b, st, k: (0, 0)))
            in_specs.append(pl.BlockSpec((co, 1), lambda b, st, k: (0, 0)))
            args.extend([w, bias])

    kernel = _build_msg_kernel(n_scales, Kcs, n_layers, offs, couts, s_tile)

    return pl.pallas_call(
        kernel,
        out_shape=jax.ShapeDtypeStruct((B, c_total, plan["S_pad"]), jnp.float32),
        grid=grid,
        in_specs=in_specs,
        out_specs=pl.BlockSpec((None, c_total, s_tile),
                               lambda b, st, k: (b, 0, st)),
        compiler_params=pltpu.CompilerParams(
            dimension_semantics=("parallel", "parallel", "arbitrary"),
            vmem_limit_bytes=plan["vmem_limit"]),
    )(*args)


# ----------------------------------------------------------------------------
# Module: parameter construction + forward
# ----------------------------------------------------------------------------
def init_msg_params(key, in_channel, mlp_list, bn_eps=1e-5):
    """Deterministic synthetic params.  Conv bias + eval-mode BatchNorm are
    folded into (weight[Cout,Cin], bias[Cout,1]) per layer."""
    params = []
    for mlp in mlp_list:
        layers = []
        last = in_channel + 3
        for out_c in mlp:
            key, kw, kb, kg, kbeta = jax.random.split(key, 5)
            w = 0.1 * jax.random.normal(kw, (out_c, last), jnp.float32)
            conv_b = 0.05 * jax.random.normal(kb, (out_c,), jnp.float32)
            gamma = 1.0 + 0.1 * jax.random.normal(kg, (out_c,), jnp.float32)
            beta = 0.05 * jax.random.normal(kbeta, (out_c,), jnp.float32)
            running_mean = jnp.zeros((out_c,), jnp.float32)
            running_var = jnp.ones((out_c,), jnp.float32)
            # TODO(synk): PyTorch default is train-mode BN (batch stats); here
            # BN uses eval-mode running statistics folded into weight/bias.
            s = gamma / jnp.sqrt(running_var + bn_eps)
            w_folded = w * s[:, None]
            b_folded = ((conv_b - running_mean) * s + beta)[:, None]
            layers.append((w_folded, b_folded))
            last = out_c
        params.append(layers)
    return params


def pointnet_sa_msg_forward(xyz, points, params, npoint, radius_list, nsample_list):
    """xyz: [B, 3, N], points: [B, D, N] or None.
    Returns (new_xyz [B, 3, S], new_points_concat [B, sum(Cout_last), S])."""
    B = xyz.shape[0]
    D = 0 if points is None else points.shape[1]
    cins = [D + 3] * len(radius_list)
    max_couts = [max(w.shape[0] for (w, _) in layers) for layers in params]
    couts = [layers[-1][0].shape[0] for layers in params]
    c_total = sum(couts)

    plan = plan_msg_tiling(B, npoint, list(nsample_list), cins, max_couts, c_total)
    new_xyz_cf, grouped6 = prepare_groups(
        xyz, points, npoint, radius_list, nsample_list, plan)
    grouped5 = [g.reshape(g.shape[0], g.shape[1], g.shape[2], g.shape[3], -1)
                for g in grouped6]
    params_bf16 = [[(w.astype(jnp.bfloat16), b) for (w, b) in layers]
                   for layers in params]
    out_pad = run_msg_mlp_fused(grouped5, params_bf16, plan, c_total)
    return new_xyz_cf, out_pad[:, :, :npoint]


# Pure-JAX reference for the fused MLP + max (f32 weights), for checking.
def msg_mlp_reference(grouped6_list, params_list, S):
    outs = []
    for g, layers in zip(grouped6_list, params_list):
        h = g.astype(jnp.float32)                      # [B, u, n, c, k, t]
        for (w, b) in layers:
            h = jnp.einsum("oc,bunckt->bunokt", w, h) + b[:, :, None]
            h = jnp.maximum(h, 0.0)
        m = jnp.max(h, axis=(2, 4))                    # [B, u, Cout, t]
        Bb, n_st, co, st = m.shape
        m = jnp.transpose(m, (0, 2, 1, 3)).reshape(Bb, co, n_st * st)
        outs.append(m[:, :, :S])
    return jnp.concatenate(outs, axis=1)


# ----------------------------------------------------------------------------
if __name__ == "__main__":
    key = jax.random.PRNGKey(0)
    k_xyz, k_pts, k_par = jax.random.split(key, 3)

    # Small shapes consistent with the module.
    B, N, D = 2, 16, 4          # batch, points, feature channels (in_channel)
    npoint = 8
    radius_list = (0.3, 0.6)
    nsample_list = (4, 8)
    mlp_list = ((16, 32), (16, 32))
    c_total = sum(m[-1] for m in mlp_list)

    xyz = jax.random.normal(k_xyz, (B, 3, N), jnp.float32)      # [B, 3, N]
    points = jax.random.normal(k_pts, (B, D, N), jnp.float32)   # [B, D, N]
    params = init_msg_params(k_par, D, mlp_list)

    # Full forward (jitted), Pallas kernel on the hot path.
    fwd = jax.jit(functools.partial(
        pointnet_sa_msg_forward, npoint=npoint,
        radius_list=radius_list, nsample_list=nsample_list))
    new_xyz, new_points_concat = fwd(xyz, points, params)
    jax.block_until_ready((new_xyz, new_points_concat))

    assert new_xyz.shape == (B, 3, npoint)
    assert new_points_concat.shape == (B, c_total, npoint)

    # Correctness check: Pallas kernel vs f32 JAX reference on the SAME
    # grouped tensors (kernel uses bf16 MXU inputs -> loose tolerance).
    cins = [D + 3, D + 3]
    max_couts = [max(m) for m in mlp_list]
    plan = plan_msg_tiling(B, npoint, list(nsample_list), cins, max_couts, c_total)
    _, grouped6 = prepare_groups(xyz, points, npoint, radius_list, nsample_list, plan)
    grouped5 = [g.reshape(g.shape[0], g.shape[1], g.shape[2], g.shape[3], -1)
                for g in grouped6]
    params_bf16 = [[(w.astype(jnp.bfloat16), b) for (w, b) in layers]
                   for layers in params]
    pal_out = run_msg_mlp_fused(grouped5, params_bf16, plan, c_total)[:, :, :npoint]
    ref_out = msg_mlp_reference(grouped6, params, npoint)
    jax.block_until_ready((pal_out, ref_out))
    max_err = float(jnp.max(jnp.abs(pal_out - ref_out)))
    assert jnp.allclose(pal_out, ref_out, atol=2e-2, rtol=2e-2), max_err

    print("KERNEL_OK")
</pallas_src>

<mosaic_0001>
module attributes {stable_mosaic.version = 11 : i64} {
  func.func @kernel(%arg0: i32, %arg1: i32, %arg2: i32, %arg3: memref<1x1x1x7x512xbf16, #tpu.memory_space<vmem>>, %arg4: memref<1x1x1x7x1024xbf16, #tpu.memory_space<vmem>>, %arg5: memref<16x7xbf16, #tpu.memory_space<vmem>>, %arg6: memref<16x1xf32, #tpu.memory_space<vmem>>, %arg7: memref<32x16xbf16, #tpu.memory_space<vmem>>, %arg8: memref<32x1xf32, #tpu.memory_space<vmem>>, %arg9: memref<16x7xbf16, #tpu.memory_space<vmem>>, %arg10: memref<16x1xf32, #tpu.memory_space<vmem>>, %arg11: memref<32x16xbf16, #tpu.memory_space<vmem>>, %arg12: memref<32x1xf32, #tpu.memory_space<vmem>>, %arg13: memref<1x64x128xf32, #tpu.memory_space<vmem>>) attributes {dimension_semantics = [#tpu.dimension_semantics<parallel>, #tpu.dimension_semantics<parallel>, #tpu.dimension_semantics<arbitrary>], iteration_bounds = array<i64: 2, 1, 1>, scalar_prefetch = 0 : i64, scratch_operands = 0 : i64, tpu.core_type = #tpu.core_type<tc>, window_params = [{transform_indices = @transform_0, window_bounds = array<i64: 1, 1, 1, 7, 512>}, {transform_indices = @transform_1, window_bounds = array<i64: 1, 1, 1, 7, 1024>}, {pipeline_mode = #tpu.pipeline_mode<synchronous>, transform_indices = @transform_2, window_bounds = array<i64: 16, 7>}, {pipeline_mode = #tpu.pipeline_mode<synchronous>, transform_indices = @transform_3, window_bounds = array<i64: 16, 1>}, {pipeline_mode = #tpu.pipeline_mode<synchronous>, transform_indices = @transform_4, window_bounds = array<i64: 32, 16>}, {pipeline_mode = #tpu.pipeline_mode<synchronous>, transform_indices = @transform_5, window_bounds = array<i64: 32, 1>}, {pipeline_mode = #tpu.pipeline_mode<synchronous>, transform_indices = @transform_6, window_bounds = array<i64: 16, 7>}, {pipeline_mode = #tpu.pipeline_mode<synchronous>, transform_indices = @transform_7, window_bounds = array<i64: 16, 1>}, {pipeline_mode = #tpu.pipeline_mode<synchronous>, transform_indices = @transform_8, window_bounds = array<i64: 32, 16>}, {pipeline_mode = #tpu.pipeline_mode<synchronous>, transform_indices = @transform_9, window_bounds = array<i64: 32, 1>}, {transform_indices = @transform_10, window_bounds = array<i64: 1, 64, 128>}]} {
    %c0_i32 = arith.constant 0 : i32
    %0 = arith.cmpi eq, %arg2, %c0_i32 : i32
    %1 = arith.extui %0 : i1 to i32
    %c0_i32_0 = arith.constant 0 : i32
    %2 = arith.cmpi ne, %1, %c0_i32_0 : i32
    scf.if %2 {
      %cst_44 = arith.constant 0.000000e+00 : f32
      %71 = vector.broadcast %cst_44 : f32 to vector<64x128xf32>
      %c0_45 = arith.constant 0 : index
      %c0_46 = arith.constant 0 : index
      %c0_47 = arith.constant 0 : index
      %72 = vector.load %arg13[%c0_45, %c0_46, %c0_47] : memref<1x64x128xf32, #tpu.memory_space<vmem>>, vector<1x64x128xf32>
      %73 = vector.shape_cast %72 : vector<1x64x128xf32> to vector<64x128xf32>
      %74 = vector.shape_cast %71 : vector<64x128xf32> to vector<1x64x128xf32>
      tpu.vector_store %arg13[%c0_45, %c0_46, %c0_47], %74 {strides = array<i32>} : memref<1x64x128xf32, #tpu.memory_space<vmem>>, vector<1x64x128xf32>,
    } else {
    }
    %c0 = arith.constant 0 : index
    %c0_1 = arith.constant 0 : index
    %c0_2 = arith.constant 0 : index
    %c0_3 = arith.constant 0 : index
    %c0_4 = arith.constant 0 : index
    %3 = vector.load %arg3[%c0, %c0_1, %c0_2, %c0_3, %c0_4] : memref<1x1x1x7x512xbf16, #tpu.memory_space<vmem>>, vector<1x1x1x7x512xbf16>
    %4 = vector.shape_cast %3 : vector<1x1x1x7x512xbf16> to vector<7x512xbf16>
    %c0_5 = arith.constant 0 : index
    %c0_6 = arith.constant 0 : index
    %5 = vector.load %arg5[%c0_5, %c0_6] : memref<16x7xbf16, #tpu.memory_space<vmem>>, vector<16x7xbf16>
    %cst = arith.constant dense<0.000000e+00> : vector<16x512xf32>
    %6 = tpu.matmul %5, %4, %cst {dimension_numbers = #tpu.dot_dimension_numbers<[1], [0], [0], [1], [0, 0, 1, 1], [], []>} : vector<16x7xbf16>, vector<7x512xbf16>, vector<16x512xf32> -> vector<16x512xf32>
    %c0_7 = arith.constant 0 : index
    %c0_8 = arith.constant 0 : index
    %7 = vector.load %arg6[%c0_7, %c0_8] : memref<16x1xf32, #tpu.memory_space<vmem>>, vector<16x1xf32>
    %8 = vector.broadcast %7 : vector<16x1xf32> to vector<16x512xf32>
    %9 = arith.addf %6, %8 : vector<16x512xf32>
    %cst_9 = arith.constant 0.000000e+00 : f32
    %10 = vector.broadcast %cst_9 : f32 to vector<16x512xf32>
    %11 = arith.maximumf %9, %10 : vector<16x512xf32>
    %12 = arith.truncf %11 : vector<16x512xf32> to vector<16x512xbf16>
    %c0_10 = arith.constant 0 : index
    %c0_11 = arith.constant 0 : index
    %13 = vector.load %arg7[%c0_10, %c0_11] : memref<32x16xbf16, #tpu.memory_space<vmem>>, vector<32x16xbf16>
    %cst_12 = arith.constant dense<0.000000e+00> : vector<32x512xf32>
    %14 = tpu.matmul %13, %12, %cst_12 {dimension_numbers = #tpu.dot_dimension_numbers<[1], [0], [0], [1], [0, 0, 1, 1], [], []>} : vector<32x16xbf16>, vector<16x512xbf16>, vector<32x512xf32> -> vector<32x512xf32>
    %c0_13 = arith.constant 0 : index
    %c0_14 = arith.constant 0 : index
    %15 = vector.load %arg8[%c0_13, %c0_14] : memref<32x1xf32, #tpu.memory_space<vmem>>, vector<32x1xf32>
    %16 = vector.broadcast %15 : vector<32x1xf32> to vector<32x512xf32>
    %17 = arith.addf %14, %16 : vector<32x512xf32>
    %cst_15 = arith.constant 0.000000e+00 : f32
    %18 = vector.broadcast %cst_15 : f32 to vector<32x512xf32>
    %19 = arith.maximumf %17, %18 : vector<32x512xf32>
    %20 = vector.extract_strided_slice %19 {offsets = [0, 0], sizes = [32, 128], strides = [1, 1]} : vector<32x512xf32> to vector<32x128xf32>
    %21 = vector.extract_strided_slice %19 {offsets = [0, 128], sizes = [32, 128], strides = [1, 1]} : vector<32x512xf32> to vector<32x128xf32>
    %22 = arith.maximumf %20, %21 : vector<32x128xf32>
    %23 = vector.extract_strided_slice %19 {offsets = [0, 256], sizes = [32, 128], strides = [1, 1]} : vector<32x512xf32> to vector<32x128xf32>
    %24 = arith.maximumf %22, %23 : vector<32x128xf32>
    %25 = vector.extract_strided_slice %19 {offsets = [0, 384], sizes = [32, 128], strides = [1, 1]} : vector<32x512xf32> to vector<32x128xf32>
    %26 = arith.maximumf %24, %25 : vector<32x128xf32>
    %c0_16 = arith.constant 0 : index
    %c0_17 = arith.constant 0 : index
    %c0_18 = arith.constant 0 : index
    %27 = vector.load %arg13[%c0_16, %c0_17, %c0_18] : memref<1x64x128xf32, #tpu.memory_space<vmem>>, vector<1x32x128xf32>
    %28 = vector.shape_cast %27 : vector<1x32x128xf32> to vector<32x128xf32>
    %29 = arith.maximumf %28, %26 : vector<32x128xf32>
    %c0_19 = arith.constant 0 : index
    %c0_20 = arith.constant 0 : index
    %c0_21 = arith.constant 0 : index
    %30 = vector.load %arg13[%c0_19, %c0_20, %c0_21] : memref<1x64x128xf32, #tpu.memory_space<vmem>>, vector<1x32x128xf32>
    %31 = vector.shape_cast %30 : vector<1x32x128xf32> to vector<32x128xf32>
    %32 = vector.shape_cast %29 : vector<32x128xf32> to vector<1x32x128xf32>
    tpu.vector_store %arg13[%c0_19, %c0_20, %c0_21], %32 {strides = array<i32>} : memref<1x64x128xf32, #tpu.memory_space<vmem>>, vector<1x32x128xf32>,
    %c0_22 = arith.constant 0 : index
    %c0_23 = arith.constant 0 : index
    %c0_24 = arith.constant 0 : index
    %c0_25 = arith.constant 0 : index
    %c0_26 = arith.constant 0 : index
    %33 = vector.load %arg4[%c0_22, %c0_23, %c0_24, %c0_25, %c0_26] : memref<1x1x1x7x1024xbf16, #tpu.memory_space<vmem>>, vector<1x1x1x7x1024xbf16>
    %34 = vector.shape_cast %33 : vector<1x1x1x7x1024xbf16> to vector<7x1024xbf16>
    %c0_27 = arith.constant 0 : index
    %c0_28 = arith.constant 0 : index
    %35 = vector.load %arg9[%c0_27, %c0_28] : memref<16x7xbf16, #tpu.memory_space<vmem>>, vector<16x7xbf16>
    %cst_29 = arith.constant dense<0.000000e+00> : vector<16x1024xf32>
    %36 = tpu.matmul %35, %34, %cst_29 {dimension_numbers = #tpu.dot_dimension_numbers<[1], [0], [0], [1], [0, 0, 1, 1], [], []>} : vector<16x7xbf16>, vector<7x1024xbf16>, vector<16x1024xf32> -> vector<16x1024xf32>
    %c0_30 = arith.constant 0 : index
    %c0_31 = arith.constant 0 : index
    %37 = vector.load %arg10[%c0_30, %c0_31] : memref<16x1xf32, #tpu.memory_space<vmem>>, vector<16x1xf32>
    %38 = vector.broadcast %37 : vector<16x1xf32> to vector<16x1024xf32>
    %39 = arith.addf %36, %38 : vector<16x1024xf32>
    %cst_32 = arith.constant 0.000000e+00 : f32
    %40 = vector.broadcast %cst_32 : f32 to vector<16x1024xf32>
    %41 = arith.maximumf %39, %40 : vector<16x1024xf32>
    %42 = arith.truncf %41 : vector<16x1024xf32> to vector<16x1024xbf16>
    %c0_33 = arith.constant 0 : index
    %c0_34 = arith.constant 0 : index
    %43 = vector.load %arg11[%c0_33, %c0_34] : memref<32x16xbf16, #tpu.memory_space<vmem>>, vector<32x16xbf16>
    %cst_35 = arith.constant dense<0.000000e+00> : vector<32x1024xf32>
    %44 = tpu.matmul %43, %42, %cst_35 {dimension_numbers = #tpu.dot_dimension_numbers<[1], [0], [0], [1], [0, 0, 1, 1], [], []>} : vector<32x16xbf16>, vector<16x1024xbf16>, vector<32x1024xf32> -> vector<32x1024xf32>
    %c0_36 = arith.constant 0 : index
    %c0_37 = arith.constant 0 : index
    %45 = vector.load %arg12[%c0_36, %c0_37] : memref<32x1xf32, #tpu.memory_space<vmem>>, vector<32x1xf32>
    %46 = vector.broadcast %45 : vector<32x1xf32> to vector<32x1024xf32>
    %47 = arith.addf %44, %46 : vector<32x1024xf32>
    %cst_38 = arith.constant 0.000000e+00 : f32
    %48 = vector.broadcast %cst_38 : f32 to vector<32x1024xf32>
    %49 = arith.maximumf %47, %48 : vector<32x1024xf32>
    %50 = vector.extract_strided_slice %49 {offsets = [0, 0], sizes = [32, 128], strides = [1, 1]} : vector<32x1024xf32> to vector<32x128xf32>
    %51 = vector.extract_strided_slice %49 {offsets = [0, 128], sizes = [32, 128], strides = [1, 1]} : vector<32x1024xf32> to vector<32x128xf32>
    %52 = arith.maximumf %50, %51 : vector<32x128xf32>
    %53 = vector.extract_strided_slice %49 {offsets = [0, 256], sizes = [32, 128], strides = [1, 1]} : vector<32x1024xf32> to vector<32x128xf32>
    %54 = arith.maximumf %52, %53 : vector<32x128xf32>
    %55 = vector.extract_strided_slice %49 {offsets = [0, 384], sizes = [32, 128], strides = [1, 1]} : vector<32x1024xf32> to vector<32x128xf32>
    %56 = arith.maximumf %54, %55 : vector<32x128xf32>
    %57 = vector.extract_strided_slice %49 {offsets = [0, 512], sizes = [32, 128], strides = [1, 1]} : vector<32x1024xf32> to vector<32x128xf32>
    %58 = arith.maximumf %56, %57 : vector<32x128xf32>
    %59 = vector.extract_strided_slice %49 {offsets = [0, 640], sizes = [32, 128], strides = [1, 1]} : vector<32x1024xf32> to vector<32x128xf32>
    %60 = arith.maximumf %58, %59 : vector<32x128xf32>
    %61 = vector.extract_strided_slice %49 {offsets = [0, 768], sizes = [32, 128], strides = [1, 1]} : vector<32x1024xf32> to vector<32x128xf32>
    %62 = arith.maximumf %60, %61 : vector<32x128xf32>
    %63 = vector.extract_strided_slice %49 {offsets = [0, 896], sizes = [32, 128], strides = [1, 1]} : vector<32x1024xf32> to vector<32x128xf32>
    %64 = arith.maximumf %62, %63 : vector<32x128xf32>
    %c0_39 = arith.constant 0 : index
    %c32 = arith.constant 32 : index
    %c0_40 = arith.constant 0 : index
    %65 = vector.load %arg13[%c0_39, %c32, %c0_40] : memref<1x64x128xf32, #tpu.memory_space<vmem>>, vector<1x32x128xf32>
    %66 = vector.shape_cast %65 : vector<1x32x128xf32> to vector<32x128xf32>
    %67 = arith.maximumf %66, %64 : vector<32x128xf32>
    %c0_41 = arith.constant 0 : index
    %c32_42 = arith.constant 32 : index
    %c0_43 = arith.constant 0 : index
    %68 = vector.load %arg13[%c0_41, %c32_42, %c0_43] : memref<1x64x128xf32, #tpu.memory_space<vmem>>, vector<1x32x128xf32>
    %69 = vector.shape_cast %68 : vector<1x32x128xf32> to vector<32x128xf32>
    %70 = vector.shape_cast %67 : vector<32x128xf32> to vector<1x32x128xf32>
    tpu.vector_store %arg13[%c0_41, %c32_42, %c0_43], %70 {strides = array<i32>} : memref<1x64x128xf32, #tpu.memory_space<vmem>>, vector<1x32x128xf32>,
    return
  }
  func.func @transform_0(%arg0: i32, %arg1: i32, %arg2: i32) -> (i32, i32, i32, i32, i32) {
    %c0_i32 = arith.constant 0 : i32
    %c0_i32_0 = arith.constant 0 : i32
    %c0_i32_1 = arith.constant 0 : i32
    return %arg0, %arg1, %arg2, %c0_i32, %c0_i32_0 : i32, i32, i32, i32, i32
  }
  func.func @transform_1(%arg0: i32, %arg1: i32, %arg2: i32) -> (i32, i32, i32, i32, i32) {
    %c0_i32 = arith.constant 0 : i32
    %c0_i32_0 = arith.constant 0 : i32
    %c0_i32_1 = arith.constant 0 : i32
    return %arg0, %arg1, %arg2, %c0_i32, %c0_i32_0 : i32, i32, i32, i32, i32
  }
  func.func @transform_2(%arg0: i32, %arg1: i32, %arg2: i32) -> (i32, i32) {
    %c0_i32 = arith.constant 0 : i32
    %c0_i32_0 = arith.constant 0 : i32
    %c0_i32_1 = arith.constant 0 : i32
    return %c0_i32, %c0_i32_0 : i32, i32
  }
  func.func @transform_3(%arg0: i32, %arg1: i32, %arg2: i32) -> (i32, i32) {
    %c0_i32 = arith.constant 0 : i32
    %c0_i32_0 = arith.constant 0 : i32
    %c0_i32_1 = arith.constant 0 : i32
    return %c0_i32, %c0_i32_0 : i32, i32
  }
  func.func @transform_4(%arg0: i32, %arg1: i32, %arg2: i32) -> (i32, i32) {
    %c0_i32 = arith.constant 0 : i32
    %c0_i32_0 = arith.constant 0 : i32
    %c0_i32_1 = arith.constant 0 : i32
    return %c0_i32, %c0_i32_0 : i32, i32
  }
  func.func @transform_5(%arg0: i32, %arg1: i32, %arg2: i32) -> (i32, i32) {
    %c0_i32 = arith.constant 0 : i32
    %c0_i32_0 = arith.constant 0 : i32
    %c0_i32_1 = arith.constant 0 : i32
    return %c0_i32, %c0_i32_0 : i32, i32
  }
  func.func @transform_6(%arg0: i32, %arg1: i32, %arg2: i32) -> (i32, i32) {
    %c0_i32 = arith.constant 0 : i32
    %c0_i32_0 = arith.constant 0 : i32
    %c0_i32_1 = arith.constant 0 : i32
    return %c0_i32, %c0_i32_0 : i32, i32
  }
  func.func @transform_7(%arg0: i32, %arg1: i32, %arg2: i32) -> (i32, i32) {
    %c0_i32 = arith.constant 0 : i32
    %c0_i32_0 = arith.constant 0 : i32
    %c0_i32_1 = arith.constant 0 : i32
    return %c0_i32, %c0_i32_0 : i32, i32
  }
  func.func @transform_8(%arg0: i32, %arg1: i32, %arg2: i32) -> (i32, i32) {
    %c0_i32 = arith.constant 0 : i32
    %c0_i32_0 = arith.constant 0 : i32
    %c0_i32_1 = arith.constant 0 : i32
    return %c0_i32, %c0_i32_0 : i32, i32
  }
  func.func @transform_9(%arg0: i32, %arg1: i32, %arg2: i32) -> (i32, i32) {
    %c0_i32 = arith.constant 0 : i32
    %c0_i32_0 = arith.constant 0 : i32
    %c0_i32_1 = arith.constant 0 : i32
    return %c0_i32, %c0_i32_0 : i32, i32
  }
  func.func @transform_10(%arg0: i32, %arg1: i32, %arg2: i32) -> (i32, i32, i32) {
    %c0_i32 = arith.constant 0 : i32
    %c0_i32_0 = arith.constant 0 : i32
    return %arg0, %c0_i32, %arg1 : i32, i32, i32
  }
}

</mosaic_0001>

<bundles_post_ra>
// kernel: custom-call.12
= control target key start
LH: loop header
LB: loop body
LE: loop exit
PB: predicated region body
PF: predicated region fallthrough
CT: control target
= control target key end

     0   :  { %s6_s0 = inlined_call_operand.vmem [shape: f32[2,16], index: 0, kind: output, shape index: {}]  }

// kernel: pointnet_sa_msg_forward.1
= control target key start
LH: loop header
LB: loop body
LE: loop exit
PB: predicated region body
PF: predicated region fallthrough
CT: control target
= control target key end

     0   :  { %s1545_s13 = smov 0   ;;  %s1547_s14 = smov 0   ;;  %s1769_s0 = inlined_call_operand.vmem [shape: bf16[2,1,1,7,512], index: 0, kind: input, shape index: {}]   ;;  %s1770_s1 = inlined_call_operand.vmem [shape: bf16[2,1,1,7,1024], index: 1, kind: input, shape index: {}]   ;;  %s1771_s2 = inlined_call_operand.vmem [shape: bf16[16,7], index: 2, kind: input, shape index: {}]   ;;  %s1772_s3 = inlined_call_operand.vmem [shape: f32[16,1], index: 3, kind: input, shape index: {}]   ;;  %s1773_s4 = inlined_call_operand.vmem [shape: bf16[32,16], index: 4, kind: input, shape index: {}]   ;;  %s1774_s5 = inlined_call_operand.vmem [shape: f32[32,1], index: 5, kind: input, shape index: {}]   ;;  %s1775_s6 = inlined_call_operand.vmem [shape: bf16[16,7], index: 6, kind: input, shape index: {}]   ;;  %s1776_s7 = inlined_call_operand.vmem [shape: f32[16,1], index: 7, kind: input, shape index: {}]   ;;  %s1777_s8 = inlined_call_operand.vmem [shape: bf16[32,16], index: 8, kind: input, shape index: {}]   ;;  %s1778_s9 = inlined_call_operand.vmem [shape: f32[32,1], index: 9, kind: input, shape index: {}]   ;;  %s1779_s10 = inlined_call_operand.vmem [shape: f32[2,64,128], index: 10, kind: output, shape index: {}]  }
   0x1   :  { %s1549_s15 = smov 0  }
   0x2 LB: > { %s39_s16 = sadd.s32 1, %s1482_s14  ;;  %p1356_p0 = scmp.ge.s32.totalorder %s1486_s15, 1  ;;  %s1486_s15 = sphi %s1549_s15, %s20_s15   ;;  %s1482_s14 = sphi %s1547_s14, %s1781_s14   ;;  %s1478_s13 = sphi %s1545_s13, %s1780_s13  }
   0x3   : > { %p41_p1 = scmp.ge.s32.totalorder %s39_s16, 2  ;;  %p367_p2 = scmp.lt.s32.totalorder %s1486_s15, 3 }
   0x5   : > { %s1783_s16 = smov (%p41_p1, %s39_s16), 0  ;;  %p368_p3 = pnand %p1356_p0, %p367_p2 }
   0x6   : > { %p429_p4 = scmp.lt.s32.totalorder (!%p368_p3), %s1478_s13, 1 }
   0x7   : > { %371 = sbr.rel (%p368_p3) target bundleno = 555 (0x22b), region = 60 }
   0xc   : > { %v480_v0 = vld [vmem:[%s1772_s3] sm:$0xff]  ;;  %v1488_v1 = vmov 0   ;;  %s1785_s13 = smov (!%p429_p4, %s1478_s13), 1  ;;  %vm511_vm0 = vcmask 1042432   ;;  %vm512_vm1 = vcmask 1043456   ;;  %v1489_v2 = vmov 65535  }
   0xd   : > { %1461 = vset.pattern.permute.xlu0 %v1488_v1  ;;  %1462 = vset.pattern.permute.xlu1 %v1488_v1  ;;  %s1425_s19 = sshll.u32 %s1785_s13, 4  ;;  %v513_v3 = vsel %vm511_vm0, 4294967295, %v1489_v2  ;;  %v481_v10 = vld [vmem:[%s1772_s3 + $0x8] sm:$0xff]  ;;  %v1428_v20 = vld [vmem:[%s1771_s2] sm:$0xff]  ;;  %vm507_vm2 = vcmask 56320   ;;  %v968_v21 = vld [vmem:[%s1778_s9 + $0x10] sm:$0xff] }
   0xe   : > { %484 = vperm.xlu0 %1461, %v480_v0   ;;  %1463 = vset.pattern.permute.xlu2 %v1488_v1  ;;  %s441_s22 = scalar_lea.vmem %s1769_s0, %s1425_s19  ;;  %v1575_v11 = vsel %vm512_vm1, %v513_v3, 0  ;;  %v600_v22 = vld [vmem:[%s1774_s5 + $0x8] sm:$0xff]  ;;  %v762_v23 = vld [vmem:[%s1776_s7] sm:$0xff]  ;;  %s1426_s19 = sshll.u32 %s1785_s13, 5  ;;  %v969_v40 = vld [vmem:[%s1778_s9 + $0x18] sm:$0xff]  ;;  %vm633_vm3 = vcmask 130048  }
   0xf   : > { %v476_v4 = vld [vmem:[%s441_s22] sm:$0xff]  ;;  %v477_v5 = vld [vmem:[%s441_s22 + $0x8] sm:$0xff]  ;;  %766 = vperm.xlu1 %1462, %v762_v23   ;;  %s1604_s22 = scalar_lea.vmem %s1770_s1, %s1426_s19  ;;  %s1427_s25 = sshll.u32 %s1785_s13, 6 }
  0x10   : > { %v499_v6 = vunpack.c.l.b16 %v476_v4  ;;  %v500_v7 = vunpack.c.h.b16 %v476_v4  ;;  %v501_v8 = vunpack.c.l.b16 %v477_v5  ;;  %v502_v9 = vunpack.c.h.b16 %v477_v5  ;;  %v763_v27 = vld [vmem:[%s1776_s7 + $0x8] sm:$0xff]  ;;  %v756_v38 = vld [vmem:[%s1604_s22] sm:$0xff]  ;;  %v601_v5 = vld [vmem:[%s1774_s5 + $0x10] sm:$0xff]  ;;  %s1677_s28 = scalar_lea.vmem %s1779_s10, %s1427_s25 }
  0x11   : > { %v757_v35 = vld [vmem:[%s1604_s22 + $0x8] sm:$0xff]  ;;  %v966_v39 = vld [vmem:[%s1778_s9] sm:$0xff]  ;;  %v783_v43 = vunpack.c.l.b16 %v756_v38  ;;  %v784_v44 = vunpack.c.h.b16 %v756_v38 }
  0x12   : > { %v503_v12 = vpack.c.b16 %v499_v6, %v499_v6  ;;  %v504_v13 = vpack.c.b16 %v500_v7, %v500_v7  ;;  %v505_v14 = vpack.c.b16 %v501_v8, %v501_v8  ;;  %v506_v15 = vpack.c.b16 %v502_v9, %v502_v9  ;;  %972 = vperm.xlu2 %1463, %v966_v39   ;;  %v1429_v55 = vld [vmem:[%s1773_s4] sm:$0xff]  ;;  %v967_v4 = vld [vmem:[%s1778_s9 + $0x8] sm:$0xff] }
  0x13   : > { %v785_v47 = vunpack.c.l.b16 %v757_v35  ;;  %v786_v48 = vunpack.c.h.b16 %v757_v35  ;;  %v791_v49 = vpack.c.b16 %v783_v43, %v783_v43  ;;  %v792_v50 = vpack.c.b16 %v784_v44, %v784_v44 }
  0x14   : > { %v516_v16 = vand.u32 %v1575_v11, %v503_v12  ;;  %v519_v17 = vand.u32 %v1575_v11, %v504_v13  ;;  %v522_v18 = vand.u32 %v1575_v11, %v505_v14  ;;  %v525_v19 = vand.u32 %v1575_v11, %v506_v15  ;;  %v758_v12 = vld [vmem:[%s1604_s22 + $0x10] sm:$0xff] }
  0x15   : > { %v803_v56 = vand.u32 %v791_v49, %v1575_v11  ;;  %v806_v57 = vand.u32 %v792_v50, %v1575_v11  ;;  %v793_v60 = vpack.c.b16 %v785_v47, %v785_v47  ;;  %v794_v61 = vpack.c.b16 %v786_v48, %v786_v48 }
  0x16   : > { %489 = vperm.xlu0 %1461, %v481_v10   ;;  %534 = vmatpush.bf16.msra.mxu0 %v516_v16  ;;  %v599_v10 = vld [vmem:[%s1774_s5] sm:$0xff]  ;;  %v787_v13 = vunpack.c.l.b16 %v758_v12  ;;  %v788_v14 = vunpack.c.h.b16 %v758_v12 }
  0x17   : > { %548 = vmatpush.bf16.msra.mxu1 %v519_v17  ;;  %562 = vmatpush.bf16.msra.mxu2 %v522_v18  ;;  %v809_v6 = vand.u32 %v793_v60, %v1575_v11  ;;  %v812_v7 = vand.u32 %v794_v61, %v1575_v11  ;;  %v1430_v17 = vld [vmem:[%s1773_s4 + $0x8] sm:$0xff] }
  0x18   : > { %576 = vmatpush.bf16.msra.mxu3 %v525_v19  ;;  %771 = vperm.xlu1 %1462, %v763_v27   ;;  %v795_v15 = vpack.c.b16 %v787_v13, %v787_v13  ;;  %v796_v16 = vpack.c.b16 %v788_v14, %v788_v14  ;;  %v602_v27 = vld [vmem:[%s1774_s5 + $0x18] sm:$0xff] }
  0x19   : > { %1367 = vmatmul.msk.bf16.vlgmr.msra.gmra.mxu0 %vm507_vm2, %v1428_v20 }
  0x1a   : > { %1368 = vmatmul.msk.bf16.vlgmr.msra.gmra.mxu1 %vm507_vm2, %v1428_v20  ;;  %1369 = vmatmul.msk.bf16.vlgmr.msra.gmra.mxu2 %vm507_vm2, %v1428_v20  ;;  %v815_v18 = vand.u32 %v795_v15, %v1575_v11  ;;  %v818_v19 = vand.u32 %v796_v16, %v1575_v11 }
  0x1b   : > { %1370 = vmatmul.msk.bf16.vlgmr.msra.gmra.mxu3 %vm507_vm2, %v1428_v20  ;;  %977 = vperm.xlu2 %1463, %v967_v4   ;;  %v759_v20 = vld [vmem:[%s1604_s22 + $0x18] sm:$0xff] }
  0x1e   : > { %982 = vperm.xlu0 %1461, %v968_v21   ;;  %v789_v21 = vunpack.c.l.b16 %v759_v20 }
  0x20   : > { %987 = vperm.xlu1 %1462, %v969_v40   ;;  %v797_v23 = vpack.c.b16 %v789_v21, %v789_v21 }
  0x23   : > { %605 = vperm.xlu2 %1463, %v599_v10  }
  0x26   : > { %610 = vperm.xlu0 %1461, %v600_v22   ;;  %v790_v22 = vunpack.c.h.b16 %v759_v20 }
  0x28   : > { %615 = vperm.xlu1 %1462, %v601_v5  }
  0x2b   : > { %620 = vperm.xlu2 %1463, %v602_v27  }
  0x80   : > { %v485_v24 = vpop.permute.xlu0 %484 }
  0x88   : > { %v490_v28 = vpop.permute.xlu0 %489 }
  0x90   : > { %v1669_v35 = vpop.permute.xlu0 %982 }
  0x96   : > { %v536_v25 = vpop.f32.mrf.mxu0 }
  0x97   : > { %v550_v26 = vpop.f32.mrf.mxu1  ;;  %v537_v29 = vadd.f32 %v536_v25, %v485_v24  ;;  %v821_v25 = vand.u32 %v797_v23, %v1575_v11 }
  0x98   : > { %v551_v30 = vadd.f32 %v550_v26, %v485_v24  ;;  %v611_v48 = vpop.permute.xlu0 %610 }
  0x99   : > { %v583_v41 = vmax.f32 %v537_v29, 0.0  ;;  %v1663_v29 = vpop.permute.xlu1 %766 }
  0x9a   : > { %v584_v42 = vmax.f32 %v551_v30, 0.0 }
  0x9d   : > { %v564_v31 = vpop.f32.mrf.mxu2 }
  0x9e   : > { %v578_v32 = vpop.f32.mrf.mxu3  ;;  %v538_v33 = vpop.f32.mrf.mxu0  ;;  %v565_v53 = vadd.f32 %v564_v31, %v485_v24 }
  0x9f   : > { %v552_v34 = vpop.f32.mrf.mxu1  ;;  %v539_v36 = vadd.f32 %v538_v33, %v490_v28  ;;  %v579_v54 = vadd.f32 %v578_v32, %v485_v24  ;;  %v798_v24 = vpack.c.b16 %v790_v22, %v790_v22 }
  0xa0   : > { %v553_v37 = vadd.f32 %v552_v34, %v490_v28  ;;  %v585_v0 = vmax.f32 %v565_v53, 0.0 }
  0xa1   : > { %v587_v45 = vmax.f32 %v539_v36, 0.0  ;;  %v586_v1 = vmax.f32 %v579_v54, 0.0  ;;  %v824_v26 = vand.u32 %v798_v24, %v1575_v11  ;;  %v1661_v11 = vpop.permute.xlu2 %972  ;;  %v1667_v31 = vpop.permute.xlu1 %771 }
  0xa2   : > { %v588_v46 = vmax.f32 %v553_v37, 0.0 }
  0xa3   : > { %v591_v51 = vpack.c.bf16 %v587_v45, %v583_v41 }
  0xa4   : > { %v592_v52 = vpack.c.bf16 %v588_v46, %v584_v42 }
  0xa5   : > { %v566_v58 = vpop.f32.mrf.mxu2  ;;  %647 = vmatpush.bf16.msrb.mxu0 %v591_v51 }
  0xa6   : > { %v580_v59 = vpop.f32.mrf.mxu3  ;;  %666 = vmatpush.bf16.msrb.mxu1 %v592_v52  ;;  %v567_v62 = vadd.f32 %v566_v58, %v490_v28 }
  0xa7   : > { %v581_v63 = vadd.f32 %v580_v59, %v490_v28  ;;  %v1431_v28 = vld [vmem:[%s1775_s6] sm:$0xff] }
  0xa8   : > { %v589_v2 = vmax.f32 %v567_v62, 0.0  ;;  %1379 = vmatmul.msk.bf16.vlgmr.msrb.gmra.mxu0 %vm633_vm3, %v1429_v55 }
  0xa9   : > { %833 = vmatpush.bf16.msra.mxu0 %v803_v56  ;;  %v590_v3 = vmax.f32 %v581_v63, 0.0  ;;  %1381 = vmatmul.msk.bf16.vlgmr.msrb.gmra.mxu1 %vm633_vm3, %v1429_v55  ;;  %v1665_v30 = vpop.permute.xlu2 %977  ;;  %v1671_v38 = vpop.permute.xlu1 %987 }
  0xaa   : > { %847 = vmatpush.bf16.msra.mxu1 %v806_v57  ;;  %v593_v8 = vpack.c.bf16 %v589_v2, %v585_v0 }
  0xab   : > { %v594_v9 = vpack.c.bf16 %v590_v3, %v586_v1 }
  0xac   : > { %685 = vmatpush.bf16.msrb.mxu2 %v593_v8 }
  0xad   : > { %704 = vmatpush.bf16.msrb.mxu3 %v594_v9  ;;  %889 = vmatpush.bf16.msrb.mxu0 %v815_v18 }
  0xae   : > { %903 = vmatpush.bf16.msrb.mxu1 %v818_v19 }
  0xaf   : > { %1383 = vmatmul.msk.bf16.vlgmr.msrb.gmra.mxu2 %vm633_vm3, %v1429_v55 }
  0xb0   : > { %861 = vmatpush.bf16.msra.mxu2 %v809_v6  ;;  %1385 = vmatmul.msk.bf16.vlgmr.msrb.gmra.mxu3 %vm633_vm3, %v1429_v55 }
  0xb1   : > { %875 = vmatpush.bf16.msra.mxu3 %v812_v7  ;;  %v606_v34 = vpop.permute.xlu2 %605  ;;  %v616_v56 = vpop.permute.xlu1 %615 }
  0xb4   : > { %917 = vmatpush.bf16.msrb.mxu2 %v821_v25 }
  0xb5   : > { %931 = vmatpush.bf16.msrb.mxu3 %v824_v26 }
  0xb8   : > { %1380 = vmatmul.msk.bf16.gmra.mxu0 %vm633_vm3, %v1430_v17 }
  0xb9   : > { %1382 = vmatmul.msk.bf16.gmra.mxu1 %vm633_vm3, %v1430_v17  ;;  %v621_v13 = vpop.permute.xlu2 %620 }
  0xbf   : > { %1384 = vmatmul.msk.bf16.gmra.mxu2 %vm633_vm3, %v1430_v17 }
  0xc0   : > { %1386 = vmatmul.msk.bf16.gmra.mxu3 %vm633_vm3, %v1430_v17 }
  0xc8   : > { %1391 = vmatmul.msk.bf16.vlgmr.msra.gmra.mxu0 %vm507_vm2, %v1431_v28 }
  0xc9   : > { %1392 = vmatmul.msk.bf16.vlgmr.msra.gmra.mxu1 %vm507_vm2, %v1431_v28 }
  0xcf   : > { %1393 = vmatmul.msk.bf16.vlgmr.msra.gmra.mxu2 %vm507_vm2, %v1431_v28 }
  0xd0   : > { %1394 = vmatmul.msk.bf16.vlgmr.msra.gmra.mxu3 %vm507_vm2, %v1431_v28 }
  0xd8   : > { %1395 = vmatmul.msk.bf16.vlgmr.msrb.gmra.mxu0 %vm507_vm2, %v1431_v28 }
  0xd9   : > { %1396 = vmatmul.msk.bf16.vlgmr.msrb.gmra.mxu1 %vm507_vm2, %v1431_v28 }
  0xdf   : > { %1397 = vmatmul.msk.bf16.vlgmr.msrb.gmra.mxu2 %vm507_vm2, %v1431_v28 }
  0xe0   : > { %1398 = vmatmul.msk.bf16.vlgmr.msrb.gmra.mxu3 %vm507_vm2, %v1431_v28 }
 0x125   : > { %v649_v32 = vpop.f32.mrf.mxu0 }
 0x126   : > { %v668_v33 = vpop.f32.mrf.mxu1  ;;  %v650_v36 = vadd.f32 %v649_v32, %v606_v34 }
 0x127   : > { %v669_v37 = vadd.f32 %v668_v33, %v606_v34 }
 0x128   : > { %v716_v41 = vmax.f32 %v650_v36, 0.0 }
 0x129   : > { %v717_v42 = vmax.f32 %v669_v37, 0.0 }
 0x12b   : > { %v732_v46 = vmax.f32 %v716_v41, %v717_v42 }
 0x12d   : > { %v651_v39 = vpop.f32.mrf.mxu0 }
 0x12e   : > { %v670_v40 = vpop.f32.mrf.mxu1  ;;  %v652_v49 = vadd.f32 %v651_v39, %v611_v48 }
 0x12f   : > { %v671_v50 = vadd.f32 %v670_v40, %v611_v48 }
 0x130   : > { %v720_v57 = vmax.f32 %v652_v49, 0.0 }
 0x131   : > { %v721_v58 = vmax.f32 %v671_v50, 0.0 }
 0x132   : > { %v687_v43 = vpop.f32.mrf.mxu2 }
 0x133   : > { %v706_v44 = vpop.f32.mrf.mxu3  ;;  %v688_v45 = vadd.f32 %v687_v43, %v606_v34  ;;  %v733_v3 = vmax.f32 %v720_v57, %v721_v58 }
 0x134   : > { %v707_v47 = vadd.f32 %v706_v44, %v606_v34 }
 0x135   : > { %v718_v51 = vmax.f32 %v688_v45, 0.0  ;;  %v654_v53 = vpop.f32.mrf.mxu0 }
 0x136   : > { %v719_v52 = vmax.f32 %v707_v47, 0.0  ;;  %v673_v54 = vpop.f32.mrf.mxu1  ;;  %v655_v62 = vadd.f32 %v654_v53, %v616_v56 }
 0x137   : > { %v736_v55 = vmax.f32 %v732_v46, %v718_v51  ;;  %v674_v2 = vadd.f32 %v673_v54, %v616_v56 }
 0x138   : > { %v724_v9 = vmax.f32 %v655_v62, 0.0 }
 0x139   : > { %v740_v59 = vmax.f32 %v736_v55, %v719_v52  ;;  %v725_v10 = vmax.f32 %v674_v2, 0.0 }
 0x13a   : > { %v689_v60 = vpop.f32.mrf.mxu2 }
 0x13b   : > { %v708_v61 = vpop.f32.mrf.mxu3  ;;  %v748_v63 = vmax.f32 %v740_v59, 0.0  ;;  %v690_v0 = vadd.f32 %v689_v60, %v611_v48  ;;  %v734_v18 = vmax.f32 %v724_v9, %v725_v10  ;;  %v1432_v60 = vld [vmem:[%s1777_s8] sm:$0xff] }
 0x13c   : > { %v709_v1 = vadd.f32 %v708_v61, %v611_v48 }
 0x13d   : > { %752 = vst [vmem:[%s1677_s28] sm:$0xff] %v748_v63  ;;  %v722_v4 = vmax.f32 %v690_v0, 0.0  ;;  %v656_v5 = vpop.f32.mrf.mxu0 }
 0x13e   : > { %v675_v6 = vpop.f32.mrf.mxu1  ;;  %v723_v8 = vmax.f32 %v709_v1, 0.0  ;;  %v657_v22 = vadd.f32 %v656_v5, %v621_v13 }
 0x13f   : > { %v737_v7 = vmax.f32 %v733_v3, %v722_v4  ;;  %v676_v23 = vadd.f32 %v675_v6, %v621_v13 }
 0x140   : > { %v728_v28 = vmax.f32 %v657_v22, 0.0 }
 0x141   : > { %v741_v12 = vmax.f32 %v737_v7, %v723_v8  ;;  %v729_v32 = vmax.f32 %v676_v23, 0.0 }
 0x142   : > { %v692_v14 = vpop.f32.mrf.mxu2 }
 0x143   : > { %v711_v15 = vpop.f32.mrf.mxu3  ;;  %v749_v16 = vmax.f32 %v741_v12, 0.0  ;;  %v693_v17 = vadd.f32 %v692_v14, %v616_v56  ;;  %v735_v43 = vmax.f32 %v728_v28, %v729_v32 }
 0x144   : > { %v712_v19 = vadd.f32 %v711_v15, %v616_v56 }
 0x145   : > { %753 = vst [vmem:[%s1677_s28 + $0x8] sm:$0xff] %v749_v16  ;;  %v726_v20 = vmax.f32 %v693_v17, 0.0  ;;  %v835_v24 = vpop.f32.mrf.mxu0 }
 0x146   : > { %v727_v21 = vmax.f32 %v712_v19, 0.0  ;;  %v849_v25 = vpop.f32.mrf.mxu1  ;;  %v836_v33 = vadd.f32 %v835_v24, %v1663_v29 }
 0x147   : > { %v738_v26 = vmax.f32 %v734_v18, %v726_v20  ;;  %v850_v34 = vadd.f32 %v849_v25, %v1663_v29 }
 0x148   : > { %v938_v46 = vmax.f32 %v836_v33, 0.0 }
 0x149   : > { %v742_v27 = vmax.f32 %v738_v26, %v727_v21  ;;  %v939_v47 = vmax.f32 %v850_v34, 0.0  ;;  %v1433_v26 = vld [vmem:[%s1777_s8 + $0x8] sm:$0xff] }
 0x14a   : > { %v694_v36 = vpop.f32.mrf.mxu2 }
 0x14b   : > { %v713_v37 = vpop.f32.mrf.mxu3  ;;  %v750_v39 = vmax.f32 %v742_v27, 0.0  ;;  %v695_v40 = vadd.f32 %v694_v36, %v621_v13 }
 0x14c   : > { %v714_v41 = vadd.f32 %v713_v37, %v621_v13 }
 0x14d   : > { %754 = vst [vmem:[%s1677_s28 + $0x10] sm:$0xff] %v750_v39  ;;  %v730_v42 = vmax.f32 %v695_v40, 0.0  ;;  %v837_v44 = vpop.f32.mrf.mxu0 }
 0x14e   : > { %v851_v45 = vpop.f32.mrf.mxu1  ;;  %v838_v48 = vadd.f32 %v837_v44, %v1667_v31  ;;  %v731_v51 = vmax.f32 %v714_v41, 0.0 }
 0x14f   : > { %v852_v49 = vadd.f32 %v851_v45, %v1667_v31  ;;  %v739_v50 = vmax.f32 %v735_v43, %v730_v42 }
 0x150   : > { %v946_v52 = vmax.f32 %v838_v48, 0.0 }
 0x151   : > { %v947_v53 = vmax.f32 %v852_v49, 0.0  ;;  %v743_v54 = vmax.f32 %v739_v50, %v731_v51 }
 0x152   : > { %v954_v55 = vpack.c.bf16 %v946_v52, %v938_v46  ;;  %v863_v57 = vpop.f32.mrf.mxu2 }
 0x153   : > { %v955_v56 = vpack.c.bf16 %v947_v53, %v939_v47  ;;  %v877_v58 = vpop.f32.mrf.mxu3  ;;  %v751_v59 = vmax.f32 %v743_v54, 0.0  ;;  %v864_v63 = vadd.f32 %v863_v57, %v1663_v29 }
 0x154   : > { %1013 = vmatpush.bf16.msra.mxu0 %v954_v55  ;;  %v878_v0 = vadd.f32 %v877_v58, %v1663_v29 }
 0x155   : > { %1032 = vmatpush.bf16.msra.mxu1 %v955_v56  ;;  %755 = vst [vmem:[%s1677_s28 + $0x18] sm:$0xff] %v751_v59  ;;  %v891_v61 = vpop.f32.mrf.mxu0  ;;  %v940_v7 = vmax.f32 %v864_v63, 0.0 }
 0x156   : > { %v905_v62 = vpop.f32.mrf.mxu1  ;;  %v892_v5 = vadd.f32 %v891_v61, %v1663_v29  ;;  %v941_v8 = vmax.f32 %v878_v0, 0.0 }
 0x157   : > { %1407 = vmatmul.msk.bf16.vlgmr.msra.gmra.mxu0 %vm633_vm3, %v1432_v60  ;;  %v906_v6 = vadd.f32 %v905_v62, %v1663_v29 }
 0x158   : > { %1409 = vmatmul.msk.bf16.vlgmr.msra.gmra.mxu1 %vm633_vm3, %v1432_v60  ;;  %v942_v18 = vmax.f32 %v892_v5, 0.0 }
 0x159   : > { %v943_v19 = vmax.f32 %v906_v6, 0.0 }
 0x15a   : > { %v865_v1 = vpop.f32.mrf.mxu2 }
 0x15b   : > { %v879_v2 = vpop.f32.mrf.mxu3  ;;  %v866_v3 = vadd.f32 %v865_v1, %v1667_v31 }
 0x15c   : > { %v880_v4 = vadd.f32 %v879_v2, %v1667_v31 }
 0x15d   : > { %v948_v9 = vmax.f32 %v866_v3, 0.0  ;;  %v893_v12 = vpop.f32.mrf.mxu0 }
 0x15e   : > { %v949_v10 = vmax.f32 %v880_v4, 0.0  ;;  %v907_v13 = vpop.f32.mrf.mxu1  ;;  %v894_v14 = vadd.f32 %v893_v12, %v1667_v31 }
 0x15f   : > { %v908_v15 = vadd.f32 %v907_v13, %v1667_v31  ;;  %v956_v16 = vpack.c.bf16 %v948_v9, %v940_v7 }
 0x160   : > { %v957_v17 = vpack.c.bf16 %v949_v10, %v941_v8  ;;  %v950_v20 = vmax.f32 %v894_v14, 0.0 }
 0x161   : > { %v951_v21 = vmax.f32 %v908_v15, 0.0  ;;  %1051 = vmatpush.bf16.msra.mxu2 %v956_v16 }
 0x162   : > { %1070 = vmatpush.bf16.msra.mxu3 %v957_v17  ;;  %v958_v22 = vpack.c.bf16 %v950_v20, %v942_v18  ;;  %v919_v24 = vpop.f32.mrf.mxu2 }
 0x163   : > { %v959_v23 = vpack.c.bf16 %v951_v21, %v943_v19  ;;  %v933_v25 = vpop.f32.mrf.mxu3  ;;  %v920_v27 = vadd.f32 %v919_v24, %v1663_v29 }
 0x164   : > { %1411 = vmatmul.msk.bf16.vlgmr.msra.gmra.mxu2 %vm633_vm3, %v1432_v60  ;;  %1089 = vmatpush.bf16.msrb.mxu0 %v958_v22  ;;  %v934_v28 = vadd.f32 %v933_v25, %v1663_v29 }
 0x165   : > { %1413 = vmatmul.msk.bf16.vlgmr.msra.gmra.mxu3 %vm633_vm3, %v1432_v60  ;;  %1108 = vmatpush.bf16.msrb.mxu1 %v959_v23  ;;  %v944_v37 = vmax.f32 %v920_v27, 0.0 }
 0x166   : > { %v945_v39 = vmax.f32 %v934_v28, 0.0 }
 0x167   : > { %1408 = vmatmul.msk.bf16.gmra.mxu0 %vm633_vm3, %v1433_v26 }
 0x168   : > { %1410 = vmatmul.msk.bf16.gmra.mxu1 %vm633_vm3, %v1433_v26 }
 0x16a   : > { %v921_v32 = vpop.f32.mrf.mxu2 }
 0x16b   : > { %v935_v33 = vpop.f32.mrf.mxu3  ;;  %v922_v34 = vadd.f32 %v921_v32, %v1667_v31 }
 0x16c   : > { %v936_v36 = vadd.f32 %v935_v33, %v1667_v31 }
 0x16d   : > { %v952_v40 = vmax.f32 %v922_v34, 0.0 }
 0x16e   : > { %v953_v41 = vmax.f32 %v936_v36, 0.0 }
 0x16f   : > { %v960_v42 = vpack.c.bf16 %v952_v40, %v944_v37 }
 0x170   : > { %v961_v43 = vpack.c.bf16 %v953_v41, %v945_v39 }
 0x171   : > { %1127 = vmatpush.bf16.msrb.mxu2 %v960_v42 }
 0x172   : > { %1146 = vmatpush.bf16.msrb.mxu3 %v961_v43 }
 0x174   : > { %1412 = vmatmul.msk.bf16.gmra.mxu2 %vm633_vm3, %v1433_v26 }
 0x175   : > { %1414 = vmatmul.msk.bf16.gmra.mxu3 %vm633_vm3, %v1433_v26 }
 0x177   : > { %1415 = vmatmul.msk.bf16.vlgmr.msrb.gmra.mxu0 %vm633_vm3, %v1432_v60 }
 0x178   : > { %1417 = vmatmul.msk.bf16.vlgmr.msrb.gmra.mxu1 %vm633_vm3, %v1432_v60 }
 0x184   : > { %1419 = vmatmul.msk.bf16.vlgmr.msrb.gmra.mxu2 %vm633_vm3, %v1432_v60 }
 0x185   : > { %1421 = vmatmul.msk.bf16.vlgmr.msrb.gmra.mxu3 %vm633_vm3, %v1432_v60 }
 0x187   : > { %1416 = vmatmul.msk.bf16.gmra.mxu0 %vm633_vm3, %v1433_v26 }
 0x188   : > { %1418 = vmatmul.msk.bf16.gmra.mxu1 %vm633_vm3, %v1433_v26 }
 0x194   : > { %1420 = vmatmul.msk.bf16.gmra.mxu2 %vm633_vm3, %v1433_v26 }
 0x195   : > { %1422 = vmatmul.msk.bf16.gmra.mxu3 %vm633_vm3, %v1433_v26 }
 0x1d4   : > { %v1015_v29 = vpop.f32.mrf.mxu0 }
 0x1d5   : > { %v1034_v31 = vpop.f32.mrf.mxu1  ;;  %v1016_v55 = vadd.f32 %v1015_v29, %v1661_v11 }
 0x1d6   : > { %v1035_v56 = vadd.f32 %v1034_v31, %v1661_v11 }
 0x1d7   : > { %v1158_v60 = vmax.f32 %v1016_v55, 0.0 }
 0x1d8   : > { %v1159_v61 = vmax.f32 %v1035_v56, 0.0 }
 0x1da   : > { %v1190_v1 = vmax.f32 %v1158_v60, %v1159_v61 }
 0x1dc   : > { %v1017_v44 = vpop.f32.mrf.mxu0 }
 0x1dd   : > { %v1036_v45 = vpop.f32.mrf.mxu1  ;;  %v1018_v2 = vadd.f32 %v1017_v44, %v1665_v30 }
 0x1de   : > { %v1037_v3 = vadd.f32 %v1036_v45, %v1665_v30 }
 0x1df   : > { %v1166_v12 = vmax.f32 %v1018_v2, 0.0 }
 0x1e0   : > { %v1167_v13 = vmax.f32 %v1037_v3, 0.0 }
 0x1e2   : > { %v1191_v22 = vmax.f32 %v1166_v12, %v1167_v13 }
 0x1e4   : > { %v1020_v46 = vpop.f32.mrf.mxu0 }
 0x1e5   : > { %v1039_v47 = vpop.f32.mrf.mxu1  ;;  %v1021_v19 = vadd.f32 %v1020_v46, %v1669_v35 }
 0x1e6   : > { %v1040_v20 = vadd.f32 %v1039_v47, %v1669_v35 }
 0x1e7   : > { %v1053_v48 = vpop.f32.mrf.mxu2  ;;  %v1174_v36 = vmax.f32 %v1021_v19, 0.0 }
 0x1e8   : > { %v1072_v49 = vpop.f32.mrf.mxu3  ;;  %v1054_v59 = vadd.f32 %v1053_v48, %v1661_v11  ;;  %v1175_v37 = vmax.f32 %v1040_v20, 0.0 }
 0x1e9   : > { %v1073_v0 = vadd.f32 %v1072_v49, %v1661_v11 }
 0x1ea   : > { %v1160_v63 = vmax.f32 %v1054_v59, 0.0  ;;  %v1192_v47 = vmax.f32 %v1174_v36, %v1175_v37 }
 0x1eb   : > { %v1161_v9 = vmax.f32 %v1073_v0, 0.0 }
 0x1ec   : > { %v1022_v50 = vpop.f32.mrf.mxu0  ;;  %v1194_v8 = vmax.f32 %v1190_v1, %v1160_v63 }
 0x1ed   : > { %v1041_v53 = vpop.f32.mrf.mxu1  ;;  %v1023_v48 = vadd.f32 %v1022_v50, %v1671_v38 }
 0x1ee   : > { %v1198_v16 = vmax.f32 %v1194_v8, %v1161_v9  ;;  %v1042_v49 = vadd.f32 %v1041_v53, %v1671_v38 }
 0x1ef   : > { %v1055_v51 = vpop.f32.mrf.mxu2  ;;  %v1182_v53 = vmax.f32 %v1023_v48, 0.0 }
 0x1f0   : > { %v1074_v52 = vpop.f32.mrf.mxu3  ;;  %v1056_v10 = vadd.f32 %v1055_v51, %v1665_v30  ;;  %v1183_v0 = vmax.f32 %v1042_v49, 0.0 }
 0x1f1   : > { %v1075_v21 = vadd.f32 %v1074_v52, %v1665_v30 }
 0x1f2   : > { %v1168_v17 = vmax.f32 %v1056_v10, 0.0  ;;  %v1193_v12 = vmax.f32 %v1182_v53, %v1183_v0 }
 0x1f3   : > { %v1169_v39 = vmax.f32 %v1075_v21, 0.0 }
 0x1f4   : > { %v1091_v54 = vpop.f32.mrf.mxu0  ;;  %v1195_v28 = vmax.f32 %v1191_v22, %v1168_v17 }
 0x1f5   : > { %v1110_v62 = vpop.f32.mrf.mxu1  ;;  %v1092_v4 = vadd.f32 %v1091_v54, %v1661_v11 }
 0x1f6   : > { %v1111_v15 = vadd.f32 %v1110_v62, %v1661_v11  ;;  %v1199_v31 = vmax.f32 %v1195_v28, %v1169_v39 }
 0x1f7   : > { %v1058_v57 = vpop.f32.mrf.mxu2  ;;  %v1162_v14 = vmax.f32 %v1092_v4, 0.0 }
 0x1f8   : > { %v1077_v58 = vpop.f32.mrf.mxu3  ;;  %v1163_v24 = vmax.f32 %v1111_v15, 0.0  ;;  %v1059_v32 = vadd.f32 %v1058_v57, %v1669_v35 }
 0x1f9   : > { %v1202_v23 = vmax.f32 %v1198_v16, %v1162_v14 }
 0x1fa   : > { %v1176_v44 = vmax.f32 %v1059_v32, 0.0 }
 0x1fb   : > { %v1206_v41 = vmax.f32 %v1202_v23, %v1163_v24 }
 0x1fc   : > { %v1093_v5 = vpop.f32.mrf.mxu0  ;;  %v1196_v61 = vmax.f32 %v1192_v47, %v1176_v44 }
 0x1fd   : > { %v1112_v18 = vpop.f32.mrf.mxu1  ;;  %v1094_v25 = vadd.f32 %v1093_v5, %v1665_v30 }
 0x1fe   : > { %v1113_v43 = vadd.f32 %v1112_v18, %v1665_v30 }
 0x1ff   : > { %v1060_v6 = vpop.f32.mrf.mxu2  ;;  %v1170_v42 = vmax.f32 %v1094_v25, 0.0 }
 0x200   : > { %v1728_v7 = vpop.f32.mrf.mxu3  ;;  %v1171_v52 = vmax.f32 %v1113_v43, 0.0  ;;  %v1061_v57 = vadd.f32 %v1060_v6, %v1671_v38 }
 0x201   : > { %v1203_v51 = vmax.f32 %v1199_v31, %v1170_v42  ;;  %v1080_v13 = vadd.f32 %v1728_v7, %v1671_v38 }
 0x202   : > { %v1184_v4 = vmax.f32 %v1061_v57, 0.0 }
 0x203   : > { %v1207_v1 = vmax.f32 %v1203_v51, %v1171_v52  ;;  %v1185_v24 = vmax.f32 %v1080_v13, 0.0 }
 0x204   : > { %v1096_v40 = vpop.f32.mrf.mxu0  ;;  %v1197_v16 = vmax.f32 %v1193_v12, %v1184_v4 }
 0x205   : > { %v1097_v54 = vadd.f32 %v1096_v40, %v1669_v35  ;;  %v1115_v55 = vpop.f32.mrf.mxu1 }
 0x206   : > { %v1116_v6 = vadd.f32 %v1115_v55, %v1669_v35 }
 0x207   : > { %v1129_v26 = vpop.f32.mrf.mxu2  ;;  %v1178_v2 = vmax.f32 %v1097_v54, 0.0 }
 0x208   : > { %v1148_v27 = vpop.f32.mrf.mxu3  ;;  %v1130_v33 = vadd.f32 %v1129_v26, %v1661_v11  ;;  %v1179_v19 = vmax.f32 %v1116_v6, 0.0 }
 0x209   : > { %v1149_v34 = vadd.f32 %v1148_v27, %v1661_v11  ;;  %v1078_v11 = vadd.f32 %v1077_v58, %v1669_v35  ;;  %v1201_v27 = vmax.f32 %v1197_v16, %v1185_v24 }
 0x20a   : > { %v1164_v29 = vmax.f32 %v1130_v33, 0.0 }
 0x20b   : > { %v1165_v46 = vmax.f32 %v1149_v34, 0.0  ;;  %v1177_v58 = vmax.f32 %v1078_v11, 0.0 }
 0x20c   : > { %v1210_v45 = vmax.f32 %v1206_v41, %v1164_v29  ;;  %v1098_v5 = vpop.f32.mrf.mxu0 }
 0x20d   : > { %v1200_v8 = vmax.f32 %v1196_v61, %v1177_v58  ;;  %v1099_v14 = vadd.f32 %v1098_v5, %v1671_v38  ;;  %v1117_v23 = vpop.f32.mrf.mxu1 }
 0x20e   : > { %v1214_v56 = vmax.f32 %v1210_v45, %v1165_v46  ;;  %v1118_v28 = vadd.f32 %v1117_v23, %v1671_v38 }
 0x20f   : > { %v1131_v59 = vpop.f32.mrf.mxu2  ;;  %v1186_v26 = vmax.f32 %v1099_v14, 0.0 }
 0x210   : > { %v1150_v60 = vpop.f32.mrf.mxu3  ;;  %v1222_v62 = vmax.f32 %v1214_v56, 0.0  ;;  %v1132_v63 = vadd.f32 %v1131_v59, %v1665_v30  ;;  %v1187_v40 = vmax.f32 %v1118_v28, 0.0 }
 0x211   : > { %v1151_v50 = vadd.f32 %v1150_v60, %v1665_v30  ;;  %v1204_v30 = vmax.f32 %v1200_v8, %v1178_v2  ;;  %v1205_v34 = vmax.f32 %v1201_v27, %v1186_v26 }
 0x212   : > { %1226 = vst [vmem:[%s1677_s28 + $0x20] sm:$0xff] %v1222_v62  ;;  %v1172_v3 = vmax.f32 %v1132_v63, 0.0 }
 0x213   : > { %v1173_v10 = vmax.f32 %v1151_v50, 0.0  ;;  %v1208_v25 = vmax.f32 %v1204_v30, %v1179_v19  ;;  %v1209_v43 = vmax.f32 %v1205_v34, %v1187_v40 }
 0x214   : > { %v1211_v9 = vmax.f32 %v1207_v1, %v1172_v3 }
 0x216   : > { %v1215_v15 = vmax.f32 %v1211_v9, %v1173_v10 }
 0x217   : > { %v1134_v17 = vpop.f32.mrf.mxu2 }
 0x218   : > { %v1153_v18 = vpop.f32.mrf.mxu3  ;;  %v1223_v20 = vmax.f32 %v1215_v15, 0.0  ;;  %v1135_v21 = vadd.f32 %v1134_v17, %v1669_v35 }
 0x219   : > { %v1154_v22 = vadd.f32 %v1153_v18, %v1669_v35 }
 0x21a   : > { %1227 = vst [vmem:[%s1677_s28 + $0x28] sm:$0xff] %v1223_v20  ;;  %v1180_v7 = vmax.f32 %v1135_v21, 0.0 }
 0x21b   : > { %v1181_v33 = vmax.f32 %v1154_v22, 0.0 }
 0x21c   : > { %v1212_v32 = vmax.f32 %v1208_v25, %v1180_v7 }
 0x21e   : > { %v1216_v36 = vmax.f32 %v1212_v32, %v1181_v33 }
 0x21f   : > { %v1136_v37 = vpop.f32.mrf.mxu2 }
 0x220   : > { %v1155_v39 = vpop.f32.mrf.mxu3  ;;  %v1224_v41 = vmax.f32 %v1216_v36, 0.0  ;;  %v1137_v35 = vadd.f32 %v1136_v37, %v1671_v38 }
 0x221   : > { %v1156_v42 = vadd.f32 %v1155_v39, %v1671_v38 }
 0x222   : > { %1228 = vst [vmem:[%s1677_s28 + $0x30] sm:$0xff] %v1224_v41  ;;  %v1188_v29 = vmax.f32 %v1137_v35, 0.0 }
 0x223   : > { %v1189_v44 = vmax.f32 %v1156_v42, 0.0 }
 0x224   : > { %v1213_v31 = vmax.f32 %v1209_v43, %v1188_v29 }
 0x226   : > { %v1217_v45 = vmax.f32 %v1213_v31, %v1189_v44 }
 0x228   : > { %v1225_v46 = vmax.f32 %v1217_v45, 0.0 }
 0x22a   : > { %1229 = vst [vmem:[%s1677_s28 + $0x38] sm:$0xff] %v1225_v46 }
 0x22b PF: > { %s20_s15 = sadd.s32 1, %s1486_s15   ;;  %s1780_s13 = smov %s1482_s14 }
 0x22c   : > { %p17_p5 = scmp.ge.s32.totalorder %s20_s15, 4   ;;  %s1781_s14 = smov %s1783_s16 }
 0x22e   :  { %19 = sbr.rel (!%p17_p5) target bundleno = 2 (0x2), region = 97 }

</bundles_post_ra>
